<compile_context>
chip_gen: v7x
topology: tpu7x:2x2x1
jax: 0.10.0
libtpu: 0.0.40
codegen_flags: <defaults>
</compile_context>

<pallas_src>
import jax
import jax.numpy as jnp
import numpy as np
from jax.experimental import pallas as pl
from jax.experimental.pallas import tpu as pltpu


def _round_up(x, m):
    return ((x + m - 1) // m) * m


def _make_cor_kernel(d_block):
    def kernel(left_ref, right_ref, out_ref):
        # left_ref / right_ref : (C, Ht, W) VMEM tiles for (batch b, h-tile hi)
        # out_ref              : (D_BLK, Ht, W) output tile at (b, d-block, hi, :)
        d_base = pl.program_id(2) * d_block

        left = left_ref[...]          # (C, Ht, W) — loaded once, reused for all inner d
        right = right_ref[...]        # (C, Ht, W)
        C, Ht, W = left.shape
        inv_c = 1.0 / C

        r2 = right.reshape(C * Ht, W)

        # Lane index, hoisted out of the disparity loop (no per-d re-materialization).
        lane = jax.lax.broadcasted_iota(jnp.int32, (Ht, W), 1)

        # Statically unrolled loop over the D_BLK disparities of this block.
        for j in range(d_block):
            d = d_base + j
            # shifted[..., w] = right[..., (w - d) mod W]; wrapped lanes (w < d)
            # are zeroed by the mask below.
            shifted = pltpu.roll(r2, shift=d, axis=1).reshape(C, Ht, W)
            prod = left * shifted                               # stays in input dtype
            corr = jnp.sum(prod, axis=0, dtype=jnp.float32) * inv_c   # f32 accumulation
            out_ref[j] = jnp.where(lane >= d, corr, 0.0).astype(out_ref.dtype)

    return kernel


def _pick_d_block(max_disp, preferred=8):
    for db in range(min(preferred, max_disp), 0, -1):
        if max_disp % db == 0:
            return db
    return 1


def _tpu_vmem_budgets():
    """Returns (h-tile sizing budget, scoped-VMEM request cap), generation aware."""
    cap = 64 << 20  # conservative fallback (v7x-sized) if the query fails
    try:
        cap = int(pltpu.get_tpu_info().vmem_capacity_bytes)
    except Exception:
        pass
    if cap <= (64 << 20):
        # v7x: 64 MiB physical VMEM per TensorCore — leave real headroom.
        return 40 << 20, int(cap * 0.85)
    # v5e / v6e: 128 MiB physical VMEM (default scoped limit is much lower).
    return 96 << 20, min(112 << 20, cap * 7 // 8)


def _pick_h_tile(C, H, W, d_block, itemsize, budget_bytes, row_multiple):
    """Largest H tile (multiple of row_multiple) whose double-buffered
    left/right/out blocks fit the VMEM budget.  Returns (h_tile, H_pad); the
    wrapper pads H to H_pad when H has no clean divisor — never over-budget."""
    # Size the compute working set at >=4 bytes/elem (f32 accumulation; on v5e
    # sub-32-bit dtypes are widened in the VPU anyway).
    eff = max(itemsize, 4)
    per_row = (2 * 2 * C * W + 2 * d_block * W) * eff   # 2 bufs x (L+R) + 2 bufs x out
    max_rows = max(budget_bytes // per_row, row_multiple)

    h_rm = _round_up(H, row_multiple)
    if h_rm <= max_rows:
        return h_rm, h_rm

    cap = max((max_rows // row_multiple) * row_multiple, row_multiple)
    # Prefer an exact divisor of H (no padding); otherwise pad H up to a tile multiple.
    t = cap
    while t >= row_multiple:
        if H % t == 0:
            return t, H
        t -= row_multiple
    return cap, _round_up(H, cap)


def cor_volume(left_feature, right_feature, max_disp, h_tile=None, d_block=None):
    B, C, H, W = left_feature.shape
    assert right_feature.shape == (B, C, H, W)
    dtype = left_feature.dtype
    itemsize = jnp.dtype(dtype).itemsize

    if d_block is None:
        d_block = _pick_d_block(max_disp)
    assert max_disp % d_block == 0
    n_d = max_disp // d_block

    budget, limit_cap = _tpu_vmem_budgets()
    # Sublane packing: 8 rows/vreg for 32-bit, 16 for 16-bit, 32 for 8-bit dtypes.
    row_multiple = {4: 8, 2: 16, 1: 32}.get(itemsize, 8)

    # Lane-dense stores: pad W up to a multiple of 128 (sliced off at the end).
    W_pad = _round_up(W, 128)

    if h_tile is None:
        h_tile, H_pad = _pick_h_tile(C, H, W_pad, d_block, itemsize, budget, row_multiple)
    else:
        H_pad = _round_up(H, h_tile)
    n_h = H_pad // h_tile

    pad_h, pad_w = H_pad - H, W_pad - W
    if pad_h or pad_w:
        pad_cfg = ((0, 0), (0, 0), (0, pad_h), (0, pad_w))
        left_feature = jnp.pad(left_feature, pad_cfg)
        right_feature = jnp.pad(right_feature, pad_cfg)

    # Actual VMEM block bytes (double-buffered inputs + output) + headroom,
    # capped safely below physical VMEM for the detected generation.
    block_bytes = (2 * 2 * C * h_tile * W_pad + 2 * d_block * h_tile * W_pad) * itemsize
    vmem_limit = int(min(max(block_bytes * 5 // 4 + (4 << 20), 16 << 20), limit_cap))

    # D innermost: left/right block indices are constant across d-blocks -> no re-DMA.
    grid = (B, n_h, n_d)

    # Keep megacore (v7x) off the D axis whenever a B/H axis can be sharded
    # instead, so both TensorCores don't duplicate the input HBM reads.
    if B * n_h >= 2:
        dim_sem = ("parallel", "parallel", "arbitrary")
    else:
        dim_sem = ("parallel", "parallel", "parallel")

    out = pl.pallas_call(
        _make_cor_kernel(d_block),
        out_shape=jax.ShapeDtypeStruct((B, max_disp, H_pad, W_pad), dtype),
        grid_spec=pltpu.PrefetchScalarGridSpec(
            num_scalar_prefetch=0,
            grid=grid,
            in_specs=[
                pl.BlockSpec((None, C, h_tile, W_pad), lambda b, hi, dk: (b, 0, hi, 0)),  # left
                pl.BlockSpec((None, C, h_tile, W_pad), lambda b, hi, dk: (b, 0, hi, 0)),  # right
            ],
            out_specs=pl.BlockSpec(
                (None, d_block, h_tile, W_pad), lambda b, hi, dk: (b, dk, hi, 0)
            ),
        ),
        compiler_params=pltpu.CompilerParams(
            dimension_semantics=dim_sem,
            vmem_limit_bytes=vmem_limit,
        ),
    )(left_feature, right_feature)

    if pad_h or pad_w:
        out = out[:, :, :H, :W]
    return out


def _reference_cor_volume(left, right, max_disp):
    B, C, H, W = left.shape
    vol = jnp.zeros((B, max_disp, H, W), left.dtype)
    for i in range(max_disp):
        if i > 0:
            corr = (left[:, :, :, i:] * right[:, :, :, : W - i]).mean(axis=1)
            vol = vol.at[:, i, :, i:].set(corr)
        else:
            vol = vol.at[:, 0].set((left * right).mean(axis=1))
    return vol


if __name__ == "__main__":
    key = jax.random.PRNGKey(0)
    k1, k2 = jax.random.split(key)

    # Primary case: lane-aligned W, H divisible by the tile.
    B, C, H, W = 2, 4, 16, 128
    max_disp = 8
    left = jax.random.normal(k1, (B, C, H, W), dtype=jnp.float32)
    right = jax.random.normal(k2, (B, C, H, W), dtype=jnp.float32)

    vol = cor_volume(left, right, max_disp)
    vol = jax.block_until_ready(vol)
    ref = _reference_cor_volume(left, right, max_disp)
    np.testing.assert_allclose(np.asarray(vol), np.asarray(ref), rtol=1e-5, atol=1e-5)
    assert vol.shape == (B, max_disp, H, W)

    # Secondary case: exercises the H/W padding path (non-multiple-of-128 W,
    # awkward H) and a non-power-of-two disparity count.
    B2, C2, H2, W2, D2 = 1, 3, 18, 120, 6
    k3, k4 = jax.random.split(k2)
    left2 = jax.random.normal(k3, (B2, C2, H2, W2), dtype=jnp.float32)
    right2 = jax.random.normal(k4, (B2, C2, H2, W2), dtype=jnp.float32)
    vol2 = jax.block_until_ready(cor_volume(left2, right2, D2))
    ref2 = _reference_cor_volume(left2, right2, D2)
    np.testing.assert_allclose(np.asarray(vol2), np.asarray(ref2), rtol=1e-5, atol=1e-5)
    assert vol2.shape == (B2, D2, H2, W2)

    print("KERNEL_OK")
</pallas_src>

<mosaic_0001>
module attributes {stable_mosaic.version = 11 : i64} {
  func.func @kernel(%arg0: i32, %arg1: i32, %arg2: i32, %arg3: memref<1x4x16x128xf32, #tpu.memory_space<vmem>>, %arg4: memref<1x4x16x128xf32, #tpu.memory_space<vmem>>, %arg5: memref<1x8x16x128xf32, #tpu.memory_space<vmem>>) attributes {dimension_semantics = [#tpu.dimension_semantics<parallel>, #tpu.dimension_semantics<parallel>, #tpu.dimension_semantics<arbitrary>], iteration_bounds = array<i64: 2, 1, 1>, scalar_prefetch = 0 : i64, scratch_operands = 0 : i64, tpu.core_type = #tpu.core_type<tc>, window_params = [{transform_indices = @transform_0, window_bounds = array<i64: 1, 4, 16, 128>}, {transform_indices = @transform_1, window_bounds = array<i64: 1, 4, 16, 128>}, {transform_indices = @transform_2, window_bounds = array<i64: 1, 8, 16, 128>}]} {
    %c8_i32 = arith.constant 8 : i32
    %0 = arith.muli %arg2, %c8_i32 : i32
    %c0 = arith.constant 0 : index
    %c0_0 = arith.constant 0 : index
    %c0_1 = arith.constant 0 : index
    %c0_2 = arith.constant 0 : index
    %1 = vector.load %arg3[%c0, %c0_0, %c0_1, %c0_2] : memref<1x4x16x128xf32, #tpu.memory_space<vmem>>, vector<1x4x16x128xf32>
    %2 = vector.shape_cast %1 : vector<1x4x16x128xf32> to vector<4x16x128xf32>
    %c0_3 = arith.constant 0 : index
    %c0_4 = arith.constant 0 : index
    %c0_5 = arith.constant 0 : index
    %c0_6 = arith.constant 0 : index
    %3 = vector.load %arg4[%c0_3, %c0_4, %c0_5, %c0_6] : memref<1x4x16x128xf32, #tpu.memory_space<vmem>>, vector<1x4x16x128xf32>
    %4 = vector.shape_cast %3 : vector<1x4x16x128xf32> to vector<4x16x128xf32>
    %5 = vector.shape_cast %4 : vector<4x16x128xf32> to vector<64x128xf32>
    %6 = tpu.iota {dimensions = array<i32: 1>} : vector<16x128xi32>
    %c0_i32 = arith.constant 0 : i32
    %7 = arith.addi %0, %c0_i32 : i32
    %8 = tpu.dynamic_rotate %5 by %7 dim 1 : vector<64x128xf32>, i32 -> vector<64x128xf32>
    %9 = vector.shape_cast %8 : vector<64x128xf32> to vector<4x16x128xf32>
    %10 = arith.mulf %2, %9 : vector<4x16x128xf32>
    %cst = arith.constant dense<0.000000e+00> : vector<16x128xf32>
    %11 = vector.multi_reduction <add>, %10, %cst [0] : vector<4x16x128xf32> to vector<16x128xf32>
    %cst_7 = arith.constant 2.500000e-01 : f32
    %12 = vector.broadcast %cst_7 : f32 to vector<16x128xf32>
    %13 = arith.mulf %11, %12 : vector<16x128xf32>
    %14 = vector.broadcast %7 : i32 to vector<16x128xi32>
    %15 = arith.cmpi sge, %6, %14 : vector<16x128xi32>
    %cst_8 = arith.constant 0.000000e+00 : f32
    %16 = vector.broadcast %cst_8 : f32 to vector<16x128xf32>
    %17 = arith.select %15, %13, %16 : vector<16x128xi1>, vector<16x128xf32>
    %c0_9 = arith.constant 0 : index
    %c0_10 = arith.constant 0 : index
    %c0_11 = arith.constant 0 : index
    %c0_12 = arith.constant 0 : index
    %18 = vector.load %arg5[%c0_9, %c0_10, %c0_11, %c0_12] : memref<1x8x16x128xf32, #tpu.memory_space<vmem>>, vector<1x1x16x128xf32>
    %19 = vector.shape_cast %18 : vector<1x1x16x128xf32> to vector<16x128xf32>
    %20 = vector.shape_cast %17 : vector<16x128xf32> to vector<1x1x16x128xf32>
    tpu.vector_store %arg5[%c0_9, %c0_10, %c0_11, %c0_12], %20 {strides = array<i32>} : memref<1x8x16x128xf32, #tpu.memory_space<vmem>>, vector<1x1x16x128xf32>,
    %c1_i32 = arith.constant 1 : i32
    %21 = arith.addi %0, %c1_i32 : i32
    %22 = tpu.dynamic_rotate %5 by %21 dim 1 : vector<64x128xf32>, i32 -> vector<64x128xf32>
    %23 = vector.shape_cast %22 : vector<64x128xf32> to vector<4x16x128xf32>
    %24 = arith.mulf %2, %23 : vector<4x16x128xf32>
    %cst_13 = arith.constant dense<0.000000e+00> : vector<16x128xf32>
    %25 = vector.multi_reduction <add>, %24, %cst_13 [0] : vector<4x16x128xf32> to vector<16x128xf32>
    %cst_14 = arith.constant 2.500000e-01 : f32
    %26 = vector.broadcast %cst_14 : f32 to vector<16x128xf32>
    %27 = arith.mulf %25, %26 : vector<16x128xf32>
    %28 = vector.broadcast %21 : i32 to vector<16x128xi32>
    %29 = arith.cmpi sge, %6, %28 : vector<16x128xi32>
    %cst_15 = arith.constant 0.000000e+00 : f32
    %30 = vector.broadcast %cst_15 : f32 to vector<16x128xf32>
    %31 = arith.select %29, %27, %30 : vector<16x128xi1>, vector<16x128xf32>
    %c0_16 = arith.constant 0 : index
    %c1 = arith.constant 1 : index
    %c0_17 = arith.constant 0 : index
    %c0_18 = arith.constant 0 : index
    %32 = vector.load %arg5[%c0_16, %c1, %c0_17, %c0_18] : memref<1x8x16x128xf32, #tpu.memory_space<vmem>>, vector<1x1x16x128xf32>
    %33 = vector.shape_cast %32 : vector<1x1x16x128xf32> to vector<16x128xf32>
    %34 = vector.shape_cast %31 : vector<16x128xf32> to vector<1x1x16x128xf32>
    tpu.vector_store %arg5[%c0_16, %c1, %c0_17, %c0_18], %34 {strides = array<i32>} : memref<1x8x16x128xf32, #tpu.memory_space<vmem>>, vector<1x1x16x128xf32>,
    %c2_i32 = arith.constant 2 : i32
    %35 = arith.addi %0, %c2_i32 : i32
    %36 = tpu.dynamic_rotate %5 by %35 dim 1 : vector<64x128xf32>, i32 -> vector<64x128xf32>
    %37 = vector.shape_cast %36 : vector<64x128xf32> to vector<4x16x128xf32>
    %38 = arith.mulf %2, %37 : vector<4x16x128xf32>
    %cst_19 = arith.constant dense<0.000000e+00> : vector<16x128xf32>
    %39 = vector.multi_reduction <add>, %38, %cst_19 [0] : vector<4x16x128xf32> to vector<16x128xf32>
    %cst_20 = arith.constant 2.500000e-01 : f32
    %40 = vector.broadcast %cst_20 : f32 to vector<16x128xf32>
    %41 = arith.mulf %39, %40 : vector<16x128xf32>
    %42 = vector.broadcast %35 : i32 to vector<16x128xi32>
    %43 = arith.cmpi sge, %6, %42 : vector<16x128xi32>
    %cst_21 = arith.constant 0.000000e+00 : f32
    %44 = vector.broadcast %cst_21 : f32 to vector<16x128xf32>
    %45 = arith.select %43, %41, %44 : vector<16x128xi1>, vector<16x128xf32>
    %c0_22 = arith.constant 0 : index
    %c2 = arith.constant 2 : index
    %c0_23 = arith.constant 0 : index
    %c0_24 = arith.constant 0 : index
    %46 = vector.load %arg5[%c0_22, %c2, %c0_23, %c0_24] : memref<1x8x16x128xf32, #tpu.memory_space<vmem>>, vector<1x1x16x128xf32>
    %47 = vector.shape_cast %46 : vector<1x1x16x128xf32> to vector<16x128xf32>
    %48 = vector.shape_cast %45 : vector<16x128xf32> to vector<1x1x16x128xf32>
    tpu.vector_store %arg5[%c0_22, %c2, %c0_23, %c0_24], %48 {strides = array<i32>} : memref<1x8x16x128xf32, #tpu.memory_space<vmem>>, vector<1x1x16x128xf32>,
    %c3_i32 = arith.constant 3 : i32
    %49 = arith.addi %0, %c3_i32 : i32
    %50 = tpu.dynamic_rotate %5 by %49 dim 1 : vector<64x128xf32>, i32 -> vector<64x128xf32>
    %51 = vector.shape_cast %50 : vector<64x128xf32> to vector<4x16x128xf32>
    %52 = arith.mulf %2, %51 : vector<4x16x128xf32>
    %cst_25 = arith.constant dense<0.000000e+00> : vector<16x128xf32>
    %53 = vector.multi_reduction <add>, %52, %cst_25 [0] : vector<4x16x128xf32> to vector<16x128xf32>
    %cst_26 = arith.constant 2.500000e-01 : f32
    %54 = vector.broadcast %cst_26 : f32 to vector<16x128xf32>
    %55 = arith.mulf %53, %54 : vector<16x128xf32>
    %56 = vector.broadcast %49 : i32 to vector<16x128xi32>
    %57 = arith.cmpi sge, %6, %56 : vector<16x128xi32>
    %cst_27 = arith.constant 0.000000e+00 : f32
    %58 = vector.broadcast %cst_27 : f32 to vector<16x128xf32>
    %59 = arith.select %57, %55, %58 : vector<16x128xi1>, vector<16x128xf32>
    %c0_28 = arith.constant 0 : index
    %c3 = arith.constant 3 : index
    %c0_29 = arith.constant 0 : index
    %c0_30 = arith.constant 0 : index
    %60 = vector.load %arg5[%c0_28, %c3, %c0_29, %c0_30] : memref<1x8x16x128xf32, #tpu.memory_space<vmem>>, vector<1x1x16x128xf32>
    %61 = vector.shape_cast %60 : vector<1x1x16x128xf32> to vector<16x128xf32>
    %62 = vector.shape_cast %59 : vector<16x128xf32> to vector<1x1x16x128xf32>
    tpu.vector_store %arg5[%c0_28, %c3, %c0_29, %c0_30], %62 {strides = array<i32>} : memref<1x8x16x128xf32, #tpu.memory_space<vmem>>, vector<1x1x16x128xf32>,
    %c4_i32 = arith.constant 4 : i32
    %63 = arith.addi %0, %c4_i32 : i32
    %64 = tpu.dynamic_rotate %5 by %63 dim 1 : vector<64x128xf32>, i32 -> vector<64x128xf32>
    %65 = vector.shape_cast %64 : vector<64x128xf32> to vector<4x16x128xf32>
    %66 = arith.mulf %2, %65 : vector<4x16x128xf32>
    %cst_31 = arith.constant dense<0.000000e+00> : vector<16x128xf32>
    %67 = vector.multi_reduction <add>, %66, %cst_31 [0] : vector<4x16x128xf32> to vector<16x128xf32>
    %cst_32 = arith.constant 2.500000e-01 : f32
    %68 = vector.broadcast %cst_32 : f32 to vector<16x128xf32>
    %69 = arith.mulf %67, %68 : vector<16x128xf32>
    %70 = vector.broadcast %63 : i32 to vector<16x128xi32>
    %71 = arith.cmpi sge, %6, %70 : vector<16x128xi32>
    %cst_33 = arith.constant 0.000000e+00 : f32
    %72 = vector.broadcast %cst_33 : f32 to vector<16x128xf32>
    %73 = arith.select %71, %69, %72 : vector<16x128xi1>, vector<16x128xf32>
    %c0_34 = arith.constant 0 : index
    %c4 = arith.constant 4 : index
    %c0_35 = arith.constant 0 : index
    %c0_36 = arith.constant 0 : index
    %74 = vector.load %arg5[%c0_34, %c4, %c0_35, %c0_36] : memref<1x8x16x128xf32, #tpu.memory_space<vmem>>, vector<1x1x16x128xf32>
    %75 = vector.shape_cast %74 : vector<1x1x16x128xf32> to vector<16x128xf32>
    %76 = vector.shape_cast %73 : vector<16x128xf32> to vector<1x1x16x128xf32>
    tpu.vector_store %arg5[%c0_34, %c4, %c0_35, %c0_36], %76 {strides = array<i32>} : memref<1x8x16x128xf32, #tpu.memory_space<vmem>>, vector<1x1x16x128xf32>,
    %c5_i32 = arith.constant 5 : i32
    %77 = arith.addi %0, %c5_i32 : i32
    %78 = tpu.dynamic_rotate %5 by %77 dim 1 : vector<64x128xf32>, i32 -> vector<64x128xf32>
    %79 = vector.shape_cast %78 : vector<64x128xf32> to vector<4x16x128xf32>
    %80 = arith.mulf %2, %79 : vector<4x16x128xf32>
    %cst_37 = arith.constant dense<0.000000e+00> : vector<16x128xf32>
    %81 = vector.multi_reduction <add>, %80, %cst_37 [0] : vector<4x16x128xf32> to vector<16x128xf32>
    %cst_38 = arith.constant 2.500000e-01 : f32
    %82 = vector.broadcast %cst_38 : f32 to vector<16x128xf32>
    %83 = arith.mulf %81, %82 : vector<16x128xf32>
    %84 = vector.broadcast %77 : i32 to vector<16x128xi32>
    %85 = arith.cmpi sge, %6, %84 : vector<16x128xi32>
    %cst_39 = arith.constant 0.000000e+00 : f32
    %86 = vector.broadcast %cst_39 : f32 to vector<16x128xf32>
    %87 = arith.select %85, %83, %86 : vector<16x128xi1>, vector<16x128xf32>
    %c0_40 = arith.constant 0 : index
    %c5 = arith.constant 5 : index
    %c0_41 = arith.constant 0 : index
    %c0_42 = arith.constant 0 : index
    %88 = vector.load %arg5[%c0_40, %c5, %c0_41, %c0_42] : memref<1x8x16x128xf32, #tpu.memory_space<vmem>>, vector<1x1x16x128xf32>
    %89 = vector.shape_cast %88 : vector<1x1x16x128xf32> to vector<16x128xf32>
    %90 = vector.shape_cast %87 : vector<16x128xf32> to vector<1x1x16x128xf32>
    tpu.vector_store %arg5[%c0_40, %c5, %c0_41, %c0_42], %90 {strides = array<i32>} : memref<1x8x16x128xf32, #tpu.memory_space<vmem>>, vector<1x1x16x128xf32>,
    %c6_i32 = arith.constant 6 : i32
    %91 = arith.addi %0, %c6_i32 : i32
    %92 = tpu.dynamic_rotate %5 by %91 dim 1 : vector<64x128xf32>, i32 -> vector<64x128xf32>
    %93 = vector.shape_cast %92 : vector<64x128xf32> to vector<4x16x128xf32>
    %94 = arith.mulf %2, %93 : vector<4x16x128xf32>
    %cst_43 = arith.constant dense<0.000000e+00> : vector<16x128xf32>
    %95 = vector.multi_reduction <add>, %94, %cst_43 [0] : vector<4x16x128xf32> to vector<16x128xf32>
    %cst_44 = arith.constant 2.500000e-01 : f32
    %96 = vector.broadcast %cst_44 : f32 to vector<16x128xf32>
    %97 = arith.mulf %95, %96 : vector<16x128xf32>
    %98 = vector.broadcast %91 : i32 to vector<16x128xi32>
    %99 = arith.cmpi sge, %6, %98 : vector<16x128xi32>
    %cst_45 = arith.constant 0.000000e+00 : f32
    %100 = vector.broadcast %cst_45 : f32 to vector<16x128xf32>
    %101 = arith.select %99, %97, %100 : vector<16x128xi1>, vector<16x128xf32>
    %c0_46 = arith.constant 0 : index
    %c6 = arith.constant 6 : index
    %c0_47 = arith.constant 0 : index
    %c0_48 = arith.constant 0 : index
    %102 = vector.load %arg5[%c0_46, %c6, %c0_47, %c0_48] : memref<1x8x16x128xf32, #tpu.memory_space<vmem>>, vector<1x1x16x128xf32>
    %103 = vector.shape_cast %102 : vector<1x1x16x128xf32> to vector<16x128xf32>
    %104 = vector.shape_cast %101 : vector<16x128xf32> to vector<1x1x16x128xf32>
    tpu.vector_store %arg5[%c0_46, %c6, %c0_47, %c0_48], %104 {strides = array<i32>} : memref<1x8x16x128xf32, #tpu.memory_space<vmem>>, vector<1x1x16x128xf32>,
    %c7_i32 = arith.constant 7 : i32
    %105 = arith.addi %0, %c7_i32 : i32
    %106 = tpu.dynamic_rotate %5 by %105 dim 1 : vector<64x128xf32>, i32 -> vector<64x128xf32>
    %107 = vector.shape_cast %106 : vector<64x128xf32> to vector<4x16x128xf32>
    %108 = arith.mulf %2, %107 : vector<4x16x128xf32>
    %cst_49 = arith.constant dense<0.000000e+00> : vector<16x128xf32>
    %109 = vector.multi_reduction <add>, %108, %cst_49 [0] : vector<4x16x128xf32> to vector<16x128xf32>
    %cst_50 = arith.constant 2.500000e-01 : f32
    %110 = vector.broadcast %cst_50 : f32 to vector<16x128xf32>
    %111 = arith.mulf %109, %110 : vector<16x128xf32>
    %112 = vector.broadcast %105 : i32 to vector<16x128xi32>
    %113 = arith.cmpi sge, %6, %112 : vector<16x128xi32>
    %cst_51 = arith.constant 0.000000e+00 : f32
    %114 = vector.broadcast %cst_51 : f32 to vector<16x128xf32>
    %115 = arith.select %113, %111, %114 : vector<16x128xi1>, vector<16x128xf32>
    %c0_52 = arith.constant 0 : index
    %c7 = arith.constant 7 : index
    %c0_53 = arith.constant 0 : index
    %c0_54 = arith.constant 0 : index
    %116 = vector.load %arg5[%c0_52, %c7, %c0_53, %c0_54] : memref<1x8x16x128xf32, #tpu.memory_space<vmem>>, vector<1x1x16x128xf32>
    %117 = vector.shape_cast %116 : vector<1x1x16x128xf32> to vector<16x128xf32>
    %118 = vector.shape_cast %115 : vector<16x128xf32> to vector<1x1x16x128xf32>
    tpu.vector_store %arg5[%c0_52, %c7, %c0_53, %c0_54], %118 {strides = array<i32>} : memref<1x8x16x128xf32, #tpu.memory_space<vmem>>, vector<1x1x16x128xf32>,
    return
  }
  func.func @transform_0(%arg0: i32, %arg1: i32, %arg2: i32) -> (i32, i32, i32, i32) {
    %c0_i32 = arith.constant 0 : i32
    %c0_i32_0 = arith.constant 0 : i32
    %c0_i32_1 = arith.constant 0 : i32
    return %arg0, %c0_i32, %arg1, %c0_i32_0 : i32, i32, i32, i32
  }
  func.func @transform_1(%arg0: i32, %arg1: i32, %arg2: i32) -> (i32, i32, i32, i32) {
    %c0_i32 = arith.constant 0 : i32
    %c0_i32_0 = arith.constant 0 : i32
    %c0_i32_1 = arith.constant 0 : i32
    return %arg0, %c0_i32, %arg1, %c0_i32_0 : i32, i32, i32, i32
  }
  func.func @transform_2(%arg0: i32, %arg1: i32, %arg2: i32) -> (i32, i32, i32, i32) {
    %c0_i32 = arith.constant 0 : i32
    %c0_i32_0 = arith.constant 0 : i32
    return %arg0, %arg2, %arg1, %c0_i32 : i32, i32, i32, i32
  }
}

</mosaic_0001>

<bundles_post_ra>
// kernel: tpu_custom_call.1
= control target key start
LH: loop header
LB: loop body
LE: loop exit
PB: predicated region body
PF: predicated region fallthrough
CT: control target
= control target key end

     0   :  { %7 = vsyncpa [#allocation3], 0  ;;  %s1504_s0 = inlined_call_operand.hbm [shape: f32[2,4,16,128], index: 0, kind: input, shape index: {}]   ;;  %s1505_s1 = inlined_call_operand.hbm [shape: f32[2,4,16,128], index: 1, kind: input, shape index: {}]   ;;  %s1506_s2 = inlined_call_operand.hbm [shape: f32[2,8,16,128], index: 2, kind: output, shape index: {}]  }
   0x1   :  { %9 = vsyncpa [#allocation3 + $0x1], 0 }
   0x2   :  { %10 = vsyncpa [#allocation6], 0 }
   0x3   :  { %12 = vsyncpa [#allocation6 + $0x1], 0 }
   0x4   :  { %13 = vsyncpa [#allocation4], 0 }
   0x5   :  { %15 = vsyncpa [#allocation4 + $0x1], 0  ;;  %s1018_s9 = smov 0   ;;  %s1020_s10 = smov 0  }
   0x6   :  { %s1022_s11 = smov 0   ;;  %s1024_s12 = smov 0  }
   0x7   :  { %s1026_s13 = smov 0   ;;  %s1028_s14 = smov 0  }
   0x8 LB: > { %s727_s15 = sadd.s32 4294967295, %s987_s14   ;;  %s728_s16 = sadd.s32 4294967294, %s987_s14   ;;  %s987_s14 = sphi %s1028_s14, %s21_s14   ;;  %s983_s13 = sphi %s1026_s13, %s1524_s13   ;;  %s979_s12 = sphi %s1024_s12, %s1523_s12   ;;  %s975_s11 = sphi %s1022_s11, %s1522_s11   ;;  %s971_s10 = sphi %s1020_s10, %s1521_s10   ;;  %s967_s9 = sphi %s1018_s9, %s1520_s9  }
   0x9   : > { %s40_s17 = sadd.s32 1, %s983_s13  ;;  %s49_s18 = sadd.s32 1, %s975_s11 }
   0xa   : > { %p42_p0 = scmp.ge.s32.totalorder %s40_s17, 2  ;;  %p56_p1 = scmp.ne.s32.totalorder %s975_s11, %s971_s10 }
   0xb   : > { %p57_p2 = scmp.eq.s32.totalorder %s987_s14, 0  ;;  %p62_p3 = scmp.ne.s32.totalorder %s971_s10, %s967_s9 }
   0xc   : > { %s1526_s17 = smov (%p42_p0, %s40_s17), 0  ;;  %p63_p5 = scmp.eq.s32.totalorder %s727_s15, 0 }
   0xd   : > { %p1059_p4 = por %p57_p2, %p56_p1  ;;  %s44_s20 = ssub.s32 %s983_s13, %s1526_s17 }
   0xe   : > { %p118_p6 = scmp.eq.s32.totalorder %s727_s15, 1  ;;  %p47_p7 = scmp.eq.s32.totalorder %s44_s20, 0 }
   0xf   : > { %p1065_p8 = por %p63_p5, %p62_p3  ;;  %p124_p10 = scmp.eq.s32.totalorder %s728_s16, 1 }
  0x10   : > { %p1069_p9 = por %p118_p6, %p56_p1  ;;  %p780_p13 = scmp.lt.s32.totalorder %s987_s14, 2 }
  0x11   : > { %s1510_s21 = scalar_select %p1065_p8, 1, 0 }
  0x12   : > { %s1511_s22 = scalar_select %p1069_p9, 1, 0 }
  0x13   : > { %s1074_s23 = scalar_select %p47_p7, %s975_s11, %s49_s18  }
  0x14   : > { %p1076_p11 = por %p124_p10, %p62_p3  ;;  %s1083_s25 = sand.u32 1, %s975_s11  }
  0x15   : > { %s731_s26 = sshll.u32 %s1083_s25, 6  ;;  %s760_s27 = sshll.u32 %s983_s13, 10 }
  0x16   : > { %s1512_s24 = scalar_select %p1076_p11, 1, 0 }
  0x17   : > { %s1092_s30 = scalar_lea.hbm %s1504_s0, %s760_s27  ;;  %s148_s3 = scalar_lea.vmem [#allocation2], %s731_s26 }
  0x18   : > { %s157_s4 = sshll.u32 %s148_s3, 4  ;;  %p1100_p0 = pnand %p780_p13, %p1059_p4  ;;  %s1096_s4 = int_to_ptr.vmem [resolvable:$true] %s157_s4 }
  0x19   : > { %s145_s6 = scalar_lea.sflag [#allocation3], %s1083_s25  ;;  %s841_s7 = scalar_lea.hbm %s1092_s30, 1024 }
  0x1a   : > { %p842_p2 = scmp.ne.s32.totalorder %s1092_s30, %s841_s7  ;;  %p843_p3 = pneg %p1100_p0 }
  0x1b   : > { %s846_s16 = scalar_lea.hbm %s1504_s0, 2048  ;;  %p847_p4 = scmp.lt.u32.totalorder %s1092_s30, %s1504_s0 }
  0x1c   : > { %p844_p5 = pnand %p843_p3, %p842_p2  ;;  %p848_p7 = scmp.lt.u32.totalorder %s846_s16, %s841_s7 }
  0x1d   : > { %p850_p13 = scmp.lt.u32.totalorder %s841_s7, %s1092_s30 }
  0x1e   : > { %p845_p6 = pneg %p844_p5  ;;  %p849_p10 = por %p848_p7, %p847_p4 }
  0x20   : > { %p851_p12 = por %p850_p13, %p849_p10 }
  0x22   : > { %p852_p1 = pnand %p851_p12, %p845_p6 }
  0x24   : > { %855 = shalt.err (!%p852_p1)
}
  0x25   : > { %s856_s20 = scalar_lea.vmem %s1096_s4, 1024  ;;  %s989_s28 = smov [#allocation2]  }
  0x26   : > { %p857_p2 = scmp.ne.s32.totalorder %s1096_s4, %s856_s20  ;;  %s861_s29 = sshll.u32 %s989_s28, 4  ;;  %s862_s29 = int_to_ptr.vmem [resolvable:$false] %s861_s29 }
  0x27   : > { %s863_s3 = scalar_lea.vmem %s862_s29, 2048  ;;  %p864_p9 = scmp.lt.s32.totalorder %s1096_s4, %s862_s29 }
  0x28   : > { %p859_p5 = pnand %p857_p2, %p843_p3  ;;  %p865_p4 = scmp.lt.s32.totalorder %s863_s3, %s856_s20 }
  0x2a   : > { %p860_p11 = pneg %p859_p5  ;;  %p866_p7 = por %p865_p4, %p864_p9 }
  0x2c   : > { %p867_p10 = pnand %p866_p7, %p860_p11 }
  0x2e   : > { %870 = shalt.err (!%p867_p10)
}
  0x2f   : > { %s990_s7 = smov 128   ;;  %s991_s8 = smov 8  }
  0x30   : > { %772 = dma.hbm_to_vmem [thread:$0]  (!%p1100_p0), %s1092_s30, 1024, %s1096_s4, %s145_s6, %s990_s7, %s990_s7, %s991_s8  }
  0x31   : > { %p188_p9 = scmp.lt.s32.totalorder %s987_s14, 3  ;;  %s1142_s18 = scalar_lea.hbm %s1505_s1, %s760_s27 }
  0x32   : > { %p1514_p11 = scmp.ge.s32.totalorder %s987_s14, 1  ;;  %s171_s20 = scalar_lea.vmem [#allocation5], %s731_s26 }
  0x33   : > { %s180_s28 = sshll.u32 %s171_s20, 4  ;;  %s168_s30 = scalar_lea.sflag [#allocation6], %s1083_s25  ;;  %s1152_s28 = int_to_ptr.vmem [resolvable:$true] %s180_s28 }
  0x34   : > { %p1146_p12 = pnand %p1514_p11, %p188_p9  ;;  %s871_s4 = scalar_lea.hbm %s1142_s18, 1024 }
  0x35   : > { %p872_p1 = scmp.ne.s32.totalorder %s1142_s18, %s871_s4  ;;  %s876_s29 = scalar_lea.hbm %s1505_s1, 2048 }
  0x36   : > { %p877_p2 = scmp.lt.u32.totalorder %s1142_s18, %s1505_s1  ;;  %p878_p5 = scmp.lt.u32.totalorder %s876_s29, %s871_s4 }
  0x37   : > { %p874_p6 = pnand %p872_p1, %p843_p3  ;;  %p880_p7 = scmp.lt.u32.totalorder %s871_s4, %s1142_s18 }
  0x38   : > { %p879_p4 = por %p878_p5, %p877_p2 }
  0x39   : > { %p875_p13 = pneg %p874_p6 }
  0x3a   : > { %p881_p10 = por %p880_p7, %p879_p4 }
  0x3c   : > { %p882_p9 = pnand %p881_p10, %p875_p13 }
  0x3e   : > { %885 = shalt.err (!%p882_p9)
}
  0x3f   : > { %s886_s26 = scalar_lea.vmem %s1152_s28, 1024  ;;  %s992_s16 = smov [#allocation5]  }
  0x40   : > { %p887_p11 = scmp.ne.s32.totalorder %s1152_s28, %s886_s26  ;;  %s891_s20 = sshll.u32 %s992_s16, 4  ;;  %s892_s20 = int_to_ptr.vmem [resolvable:$false] %s891_s20 }
  0x41   : > { %s893_s27 = scalar_lea.vmem %s892_s20, 2048  ;;  %p894_p8 = scmp.lt.s32.totalorder %s1152_s28, %s892_s20 }
  0x42   : > { %p889_p1 = pnand %p887_p11, %p843_p3  ;;  %p895_p2 = scmp.lt.s32.totalorder %s893_s27, %s886_s26 }
  0x44   : > { %p890_p6 = pneg %p889_p1  ;;  %p896_p5 = por %p895_p2, %p894_p8 }
  0x46   : > { %p897_p4 = pnand %p896_p5, %p890_p6 }
  0x48   : > { %900 = shalt.err (!%p897_p4)
}
  0x49   : > { %775 = dma.hbm_to_vmem [thread:$0]  (!%p1100_p0), %s1142_s18, 1024, %s1152_s28, %s168_s30, %s990_s7, %s990_s7, %s991_s8  }
  0x4a   : > { %192 = sbr.rel (%p1146_p12) target bundleno = 330 (0x14a), region = 28  ;;  %s1186_s4 = sand.u32 (!%p1146_p12), 1, %s971_s10  }
  0x4b   : > { %s738_s6 = sshll.u32 (!%p1146_p12), %s1186_s4, 6  ;;  %s195_s29 = scalar_lea.sflag (!%p1146_p12), [#allocation3], %s1186_s4 }
  0x4c   : > { %s1190_s5 = scalar_lea.vmem (!%p1146_p12), [#allocation2], %s738_s6  ;;  %p1516_p8 = scmp.ne.s32.totalorder (!%p1146_p12), %s1510_s21, 0 }
  0x51   : > { %954 = dma.done.wait (%p1516_p8), %s195_s29, 1024  }
  0x52   : > { %956 = vsyncadd (%p1516_p8), %s195_s29, 4294966272  ;;  %s204_s25 = scalar_lea.sflag [#allocation6], %s1186_s4  ;;  %s207_s7 = scalar_lea.vmem [#allocation5], %s738_s6 }
  0x53   : > { %958 = dma.done.wait (%p1516_p8), %s204_s25, 1024  }
  0x54   : > { %960 = vsyncadd (%p1516_p8), %s204_s25, 4294966272  ;;  %v1201_v0 = vld [vmem:[%s207_s7 + $0x10] sm:$0xff]  ;;  %v1203_v1 = vld [vmem:[%s207_s7] sm:$0xff]  ;;  %s993_s8 = smov 1   ;;  %s740_s21 = sshll.u32 %s1186_s4, 7  ;;  %v254_v42 = vlaneseq }
  0x55   : > { %303 = vrot.lane.b32.xlu1 %v1201_v0, %s993_s8  ;;  %299 = vrot.lane.b32.xlu0 %v1203_v1, %s993_s8  ;;  %v1209_v2 = vld [vmem:[%s207_s7 + $0x18] sm:$0xff]  ;;  %v1211_v3 = vld [vmem:[%s207_s7 + $0x8] sm:$0xff]  ;;  %s1274_s18 = scalar_lea.vmem [#allocation7], %s740_s21  ;;  %s994_s19 = smov 2  }
  0x56   : > { %v1213_v4 = vld [vmem:[%s207_s7 + $0x28] sm:$0xff]  ;;  %v1215_v5 = vld [vmem:[%s207_s7 + $0x20] sm:$0xff]  ;;  %v1218_v6 = vld [vmem:[%s1190_s5 + $0x10] sm:$0xff]  ;;  %s995_s28 = smov 3   ;;  %s996_s30 = smov 4   ;;  %v1348_v47 = vand.u32 127, %v254_v42 }
  0x57   : > { %v1221_v7 = vld [vmem:[%s1190_s5] sm:$0xff]  ;;  %v1224_v8 = vld [vmem:[%s1190_s5 + $0x18] sm:$0xff]  ;;  %v276_v9 = vmul.f32 %v1201_v0, %v1218_v6  ;;  %v1233_v12 = vld [vmem:[%s1190_s5 + $0x8] sm:$0xff]  ;;  %s997_s3 = smov 5   ;;  %s998_s15 = smov 6  }
  0x58   : > { %v274_v10 = vmul.f32 %v1203_v1, %v1221_v7  ;;  %v277_v11 = vmul.f32 %v1209_v2, %v1224_v8  ;;  %v1236_v13 = vld [vmem:[%s1190_s5 + $0x28] sm:$0xff]  ;;  %v1239_v14 = vld [vmem:[%s1190_s5 + $0x20] sm:$0xff]  ;;  %v1245_v15 = vld [vmem:[%s207_s7 + $0x38] sm:$0xff]  ;;  %v275_v16 = vmul.f32 %v1211_v3, %v1233_v12  ;;  %s999_s26 = smov 7   ;;  %vm332_vm0 = vcmp.ge.s32.totalorder %v1348_v47, 1  ;;  %s762_s16 = sshll.u32 %s979_s12, 11 }
  0x59   : > { %305 = vrot.lane.b32.xlu1 %v1209_v2, %s993_s8  ;;  %301 = vrot.lane.b32.xlu0 %v1211_v3, %s993_s8  ;;  %v279_v17 = vmul.f32 %v1213_v4, %v1236_v13  ;;  %v278_v18 = vmul.f32 %v1215_v5, %v1239_v14  ;;  %v1253_v19 = vld [vmem:[%s207_s7 + $0x30] sm:$0xff]  ;;  %v1256_v21 = vld [vmem:[%s1190_s5 + $0x38] sm:$0xff]  ;;  %vm374_vm1 = vcmp.ge.s32.totalorder %v1348_v47, 2  ;;  %vm416_vm2 = vcmp.ge.s32.totalorder %v1348_v47, 3  ;;  %s609_s20 = sshll.u32 %s1274_s18, 4  ;;  %s1451_s29 = scalar_lea.hbm %s1506_s2, %s762_s16  ;;  %s1453_s20 = int_to_ptr.vmem [resolvable:$true] %s609_s20 }
  0x5a   : > { %v282_v20 = vadd.f32 %v276_v9, %v274_v10  ;;  %v1259_v22 = vld [vmem:[%s1190_s5 + $0x30] sm:$0xff]  ;;  %v285_v23 = vadd.f32 %v277_v11, %v275_v16  ;;  %v281_v24 = vmul.f32 %v1245_v15, %v1256_v21  ;;  %vm458_vm3 = vcmp.ge.s32.totalorder %v1348_v47, 4  ;;  %s591_s12 = scalar_lea.sflag [#allocation4], %s1186_s4  ;;  %s901_s5 = scalar_lea.vmem %s1453_s20, 2048 }
  0x5b   : > { %v280_v25 = vmul.f32 %v1253_v19, %v1259_v22  ;;  %vm500_vm4 = vcmp.ge.s32.totalorder %v1348_v47, 5  ;;  %vm542_vm5 = vcmp.ge.s32.totalorder %v1348_v47, 6  ;;  %vm584_vm6 = vcmp.ge.s32.totalorder %v1348_v47, 7  ;;  %p902_p0 = scmp.ne.s32.totalorder %s1453_s20, %s901_s5  ;;  %p1517_p3 = scmp.ne.s32.totalorder %s1511_s22, 0 }
  0x5c   : > { %v283_v26 = vadd.f32 %v282_v20, %v278_v18  ;;  %v286_v27 = vadd.f32 %v285_v23, %v279_v17  ;;  %s1000_s25 = smov [#allocation7]  }
  0x5d   : > { %309 = vrot.lane.b32.xlu1 %v1213_v4, %s993_s8  ;;  %307 = vrot.lane.b32.xlu0 %v1215_v5, %s993_s8  ;;  %p903_p12 = pnand %p902_p0, %p1517_p3  ;;  %s905_s7 = sshll.u32 %s1000_s25, 4  ;;  %s906_s7 = int_to_ptr.vmem [resolvable:$false] %s905_s7 }
  0x5e   : > { %v284_v28 = vadd.f32 %v283_v26, %v280_v25  ;;  %v287_v29 = vadd.f32 %v286_v27, %v281_v24  ;;  %p908_p7 = scmp.lt.s32.totalorder %s1453_s20, %s906_s7 }
  0x5f   : > { %p904_p13 = pneg %p903_p12 }
  0x60   : > { %v288_v30 = vmul.f32 0.25, %v284_v28  ;;  %v289_v31 = vmul.f32 0.25, %v287_v29 }
  0x61   : > { %313 = vrot.lane.b32.xlu1 %v1245_v15, %s993_s8  ;;  %311 = vrot.lane.b32.xlu0 %v1253_v19, %s993_s8  ;;  %s907_s8 = scalar_lea.vmem %s906_s7, 4096 }
  0x62   : > { %294 = vst [vmem:[%s1274_s18] sm:$0xff] %v288_v30  ;;  %295 = vst [vmem:[%s1274_s18 + $0x8] sm:$0xff] %v289_v31  ;;  %p909_p10 = scmp.lt.s32.totalorder %s907_s8, %s901_s5 }
  0x64   : > { %p910_p9 = por %p909_p10, %p908_p7 }
  0x65   : > { %343 = vrot.lane.b32.xlu1 %v1211_v3, %s994_s19  ;;  %341 = vrot.lane.b32.xlu0 %v1203_v1, %s994_s19 }
  0x66   : > { %p911_p11 = pnand %p910_p9, %p904_p13 }
  0x69   : > { %347 = vrot.lane.b32.xlu1 %v1209_v2, %s994_s19  ;;  %345 = vrot.lane.b32.xlu0 %v1201_v0, %s994_s19 }
  0x6d   : > { %351 = vrot.lane.b32.xlu1 %v1213_v4, %s994_s19  ;;  %349 = vrot.lane.b32.xlu0 %v1215_v5, %s994_s19 }
  0x71   : > { %355 = vrot.lane.b32.xlu1 %v1245_v15, %s994_s19  ;;  %353 = vrot.lane.b32.xlu0 %v1253_v19, %s994_s19 }
  0x75   : > { %385 = vrot.lane.b32.xlu1 %v1211_v3, %s995_s28  ;;  %383 = vrot.lane.b32.xlu0 %v1203_v1, %s995_s28 }
  0x79   : > { %389 = vrot.lane.b32.xlu1 %v1209_v2, %s995_s28  ;;  %387 = vrot.lane.b32.xlu0 %v1201_v0, %s995_s28 }
  0x7d   : > { %425 = vrot.lane.b32.xlu1 %v1203_v1, %s996_s30  ;;  %391 = vrot.lane.b32.xlu0 %v1215_v5, %s995_s28 }
  0x81   : > { %429 = vrot.lane.b32.xlu1 %v1201_v0, %s996_s30  ;;  %427 = vrot.lane.b32.xlu0 %v1211_v3, %s996_s30 }
  0x85   : > { %467 = vrot.lane.b32.xlu1 %v1203_v1, %s997_s3  ;;  %431 = vrot.lane.b32.xlu0 %v1209_v2, %s996_s30 }
  0x89   : > { %471 = vrot.lane.b32.xlu1 %v1201_v0, %s997_s3  ;;  %469 = vrot.lane.b32.xlu0 %v1211_v3, %s997_s3 }
  0x8d   : > { %509 = vrot.lane.b32.xlu1 %v1203_v1, %s998_s15  ;;  %473 = vrot.lane.b32.xlu0 %v1209_v2, %s997_s3 }
  0x91   : > { %513 = vrot.lane.b32.xlu1 %v1201_v0, %s998_s15  ;;  %511 = vrot.lane.b32.xlu0 %v1211_v3, %s998_s15 }
  0x95   : > { %551 = vrot.lane.b32.xlu1 %v1203_v1, %s999_s26  ;;  %515 = vrot.lane.b32.xlu0 %v1209_v2, %s998_s15 }
  0x99   : > { %555 = vrot.lane.b32.xlu1 %v1201_v0, %s999_s26  ;;  %553 = vrot.lane.b32.xlu0 %v1211_v3, %s999_s26 }
  0x9d   : > { %393 = vrot.lane.b32.xlu1 %v1213_v4, %s995_s28  ;;  %557 = vrot.lane.b32.xlu0 %v1209_v2, %s999_s26 }
  0xa1   : > { %435 = vrot.lane.b32.xlu1 %v1213_v4, %s996_s30  ;;  %433 = vrot.lane.b32.xlu0 %v1215_v5, %s996_s30 }
  0xa5   : > { %477 = vrot.lane.b32.xlu1 %v1213_v4, %s997_s3  ;;  %475 = vrot.lane.b32.xlu0 %v1215_v5, %s997_s3 }
  0xa9   : > { %519 = vrot.lane.b32.xlu1 %v1213_v4, %s998_s15  ;;  %517 = vrot.lane.b32.xlu0 %v1215_v5, %s998_s15 }
  0xad   : > { %561 = vrot.lane.b32.xlu1 %v1213_v4, %s999_s26  ;;  %559 = vrot.lane.b32.xlu0 %v1215_v5, %s999_s26 }
  0xb1   : > { %397 = vrot.lane.b32.xlu1 %v1245_v15, %s995_s28  ;;  %395 = vrot.lane.b32.xlu0 %v1253_v19, %s995_s28 }
  0xb5   : > { %439 = vrot.lane.b32.xlu1 %v1245_v15, %s996_s30  ;;  %437 = vrot.lane.b32.xlu0 %v1253_v19, %s996_s30 }
  0xb9   : > { %481 = vrot.lane.b32.xlu1 %v1245_v15, %s997_s3  ;;  %479 = vrot.lane.b32.xlu0 %v1253_v19, %s997_s3 }
  0xbd   : > { %523 = vrot.lane.b32.xlu1 %v1245_v15, %s998_s15  ;;  %521 = vrot.lane.b32.xlu0 %v1253_v19, %s998_s15 }
  0xc1   : > { %565 = vrot.lane.b32.xlu1 %v1245_v15, %s999_s26  ;;  %563 = vrot.lane.b32.xlu0 %v1253_v19, %s999_s26 }
  0xc7   : > { %v304_v32 = vpop.permute.xlu1 %303  ;;  %v300_v33 = vpop.permute.xlu0 %299 }
  0xc8   : > { %v317_v36 = vmul.f32 %v304_v32, %v1218_v6  ;;  %v315_v37 = vmul.f32 %v300_v33, %v1221_v7 }
  0xca   : > { %v323_v45 = vadd.f32 %v317_v36, %v315_v37 }
  0xcb   : > { %v306_v34 = vpop.permute.xlu1 %305  ;;  %v302_v35 = vpop.permute.xlu0 %301 }
  0xcc   : > { %v318_v38 = vmul.f32 %v306_v34, %v1224_v8  ;;  %v316_v39 = vmul.f32 %v302_v35, %v1233_v12 }
  0xce   : > { %v326_v46 = vadd.f32 %v318_v38, %v316_v39 }
  0xcf   : > { %v310_v40 = vpop.permute.xlu1 %309  ;;  %v308_v41 = vpop.permute.xlu0 %307 }
  0xd0   : > { %v320_v43 = vmul.f32 %v310_v40, %v1236_v13  ;;  %v319_v44 = vmul.f32 %v308_v41, %v1239_v14 }
  0xd2   : > { %v327_v50 = vadd.f32 %v326_v46, %v320_v43  ;;  %v324_v51 = vadd.f32 %v323_v45, %v319_v44 }
  0xd3   : > { %v314_v48 = vpop.permute.xlu1 %313  ;;  %v312_v49 = vpop.permute.xlu0 %311 }
  0xd4   : > { %v322_v52 = vmul.f32 %v314_v48, %v1256_v21  ;;  %v321_v53 = vmul.f32 %v312_v49, %v1259_v22 }
  0xd6   : > { %v328_v54 = vadd.f32 %v327_v50, %v322_v52  ;;  %v325_v55 = vadd.f32 %v324_v51, %v321_v53 }
  0xd7   : > { %v344_v56 = vpop.permute.xlu1 %343  ;;  %v342_v57 = vpop.permute.xlu0 %341 }
  0xd8   : > { %v330_v58 = vmul.f32 0.25, %v328_v54  ;;  %v329_v59 = vmul.f32 0.25, %v325_v55  ;;  %v358_v4 = vmul.f32 %v344_v56, %v1233_v12  ;;  %v357_v5 = vmul.f32 %v342_v57, %v1221_v7 }
  0xda   : > { %v334_v60 = vsel %vm332_vm0, %v330_v58, 0.0  ;;  %v333_v61 = vsel %vm332_vm0, %v329_v59, 0.0 }
  0xdb   : > { %742 = vst [vmem:[%s1274_s18 + $0x18] sm:$0xff] %v334_v60  ;;  %741 = vst [vmem:[%s1274_s18 + $0x10] sm:$0xff] %v333_v61  ;;  %v348_v62 = vpop.permute.xlu1 %347  ;;  %v346_v63 = vpop.permute.xlu0 %345 }
  0xdc   : > { %v360_v0 = vmul.f32 %v348_v62, %v1224_v8  ;;  %v359_v1 = vmul.f32 %v346_v63, %v1218_v6 }
  0xde   : > { %v368_v11 = vadd.f32 %v360_v0, %v358_v4  ;;  %v365_v15 = vadd.f32 %v359_v1, %v357_v5 }
  0xdf   : > { %v352_v2 = vpop.permute.xlu1 %351  ;;  %v350_v3 = vpop.permute.xlu0 %349 }
  0xe0   : > { %v362_v9 = vmul.f32 %v352_v2, %v1236_v13  ;;  %v361_v10 = vmul.f32 %v350_v3, %v1239_v14 }
  0xe2   : > { %v369_v18 = vadd.f32 %v368_v11, %v362_v9  ;;  %v366_v19 = vadd.f32 %v365_v15, %v361_v10 }
  0xe3   : > { %v356_v16 = vpop.permute.xlu1 %355  ;;  %v354_v17 = vpop.permute.xlu0 %353 }
  0xe4   : > { %v364_v20 = vmul.f32 %v356_v16, %v1256_v21  ;;  %v363_v23 = vmul.f32 %v354_v17, %v1259_v22 }
  0xe6   : > { %v370_v24 = vadd.f32 %v369_v18, %v364_v20  ;;  %v367_v25 = vadd.f32 %v366_v19, %v363_v23 }
  0xe7   : > { %v386_v26 = vpop.permute.xlu1 %385  ;;  %v384_v27 = vpop.permute.xlu0 %383 }
  0xe8   : > { %v372_v28 = vmul.f32 0.25, %v370_v24  ;;  %v371_v29 = vmul.f32 0.25, %v367_v25  ;;  %v399_v60 = vmul.f32 %v384_v27, %v1221_v7  ;;  %v400_v1 = vmul.f32 %v386_v26, %v1233_v12 }
  0xea   : > { %v376_v30 = vsel %vm374_vm1, %v372_v28, 0.0  ;;  %v375_v31 = vsel %vm374_vm1, %v371_v29, 0.0 }
  0xeb   : > { %744 = vst [vmem:[%s1274_s18 + $0x28] sm:$0xff] %v376_v30  ;;  %743 = vst [vmem:[%s1274_s18 + $0x20] sm:$0xff] %v375_v31  ;;  %v390_v32 = vpop.permute.xlu1 %389  ;;  %v388_v33 = vpop.permute.xlu0 %387 }
  0xec   : > { %v401_v59 = vmul.f32 %v388_v33, %v1218_v6  ;;  %v402_v61 = vmul.f32 %v390_v32, %v1224_v8 }
  0xee   : > { %v407_v2 = vadd.f32 %v401_v59, %v399_v60  ;;  %v410_v10 = vadd.f32 %v402_v61, %v400_v1 }
  0xef   : > { %v426_v34 = vpop.permute.xlu1 %425  ;;  %v392_v35 = vpop.permute.xlu0 %391 }
  0xf0   : > { %v403_v62 = vmul.f32 %v392_v35, %v1239_v14  ;;  %v441_v11 = vmul.f32 %v426_v34, %v1221_v7 }
  0xf2   : > { %v408_v15 = vadd.f32 %v407_v2, %v403_v62 }
  0xf3   : > { %v430_v36 = vpop.permute.xlu1 %429  ;;  %v428_v37 = vpop.permute.xlu0 %427 }
  0xf4   : > { %v443_v4 = vmul.f32 %v430_v36, %v1218_v6  ;;  %v442_v17 = vmul.f32 %v428_v37, %v1233_v12 }
  0xf6   : > { %v449_v29 = vadd.f32 %v443_v4, %v441_v11 }
  0xf7   : > { %v468_v38 = vpop.permute.xlu1 %467  ;;  %v432_v39 = vpop.permute.xlu0 %431 }
  0xf8   : > { %v444_v5 = vmul.f32 %v432_v39, %v1224_v8  ;;  %v483_v18 = vmul.f32 %v468_v38, %v1221_v7 }
  0xfa   : > { %v452_v30 = vadd.f32 %v444_v5, %v442_v17 }
  0xfb   : > { %v472_v40 = vpop.permute.xlu1 %471  ;;  %v470_v41 = vpop.permute.xlu0 %469 }
  0xfc   : > { %v485_v9 = vmul.f32 %v472_v40, %v1218_v6  ;;  %v484_v25 = vmul.f32 %v470_v41, %v1233_v12 }
  0xfe   : > { %v491_v31 = vadd.f32 %v485_v9, %v483_v18 }
  0xff   : > { %v510_v42 = vpop.permute.xlu1 %509  ;;  %v474_v43 = vpop.permute.xlu0 %473 }
 0x100   : > { %v486_v16 = vmul.f32 %v474_v43, %v1224_v8  ;;  %v525_v33 = vmul.f32 %v510_v42, %v1221_v7 }
 0x102   : > { %v494_v34 = vadd.f32 %v486_v16, %v484_v25 }
 0x103   : > { %v514_v44 = vpop.permute.xlu1 %513  ;;  %v512_v45 = vpop.permute.xlu0 %511 }
 0x104   : > { %v527_v32 = vmul.f32 %v514_v44, %v1218_v6  ;;  %v526_v59 = vmul.f32 %v512_v45, %v1233_v12 }
 0x107   : > { %v552_v46 = vpop.permute.xlu1 %551  ;;  %v516_v48 = vpop.permute.xlu0 %515 }
 0x108   : > { %v567_v60 = vmul.f32 %v552_v46, %v1221_v7 }
 0x10b   : > { %v1366_v49 = vpop.permute.xlu1 %555  ;;  %v1368_v50 = vpop.permute.xlu0 %553 }
 0x10f   : > { %v394_v51 = vpop.permute.xlu1 %393  ;;  %v1370_v52 = vpop.permute.xlu0 %557 }
 0x110   : > { %v404_v3 = vmul.f32 %v394_v51, %v1236_v13 }
 0x112   : > { %v411_v26 = vadd.f32 %v410_v10, %v404_v3 }
 0x113   : > { %v436_v53 = vpop.permute.xlu1 %435  ;;  %v434_v54 = vpop.permute.xlu0 %433 }
 0x114   : > { %v446_v19 = vmul.f32 %v436_v53, %v1236_v13  ;;  %v445_v20 = vmul.f32 %v434_v54, %v1239_v14  ;;  %v533_v54 = vadd.f32 %v527_v32, %v525_v33 }
 0x116   : > { %v453_v37 = vadd.f32 %v452_v30, %v446_v19  ;;  %v450_v38 = vadd.f32 %v449_v29, %v445_v20 }
 0x117   : > { %v478_v55 = vpop.permute.xlu1 %477  ;;  %v476_v56 = vpop.permute.xlu0 %475 }
 0x118   : > { %v488_v39 = vmul.f32 %v478_v55, %v1236_v13  ;;  %v487_v40 = vmul.f32 %v476_v56, %v1239_v14  ;;  %v528_v55 = vmul.f32 %v516_v48, %v1224_v8 }
 0x11a   : > { %v495_v2 = vadd.f32 %v494_v34, %v488_v39  ;;  %v492_v3 = vadd.f32 %v491_v31, %v487_v40  ;;  %v536_v11 = vadd.f32 %v528_v55, %v526_v59 }
 0x11b   : > { %v520_v57 = vpop.permute.xlu1 %519  ;;  %v518_v58 = vpop.permute.xlu0 %517 }
 0x11c   : > { %v530_v4 = vmul.f32 %v520_v57, %v1236_v13  ;;  %v529_v5 = vmul.f32 %v518_v58, %v1239_v14  ;;  %v568_v57 = vmul.f32 %v1368_v50, %v1233_v12  ;;  %v570_v58 = vmul.f32 %v1370_v52, %v1224_v8 }
 0x11e   : > { %v537_v20 = vadd.f32 %v536_v11, %v530_v4 }
 0x11f   : > { %v1376_v63 = vpop.permute.xlu1 %561  ;;  %v1378_v0 = vpop.permute.xlu0 %559 }
 0x123   : > { %v398_v23 = vpop.permute.xlu1 %397  ;;  %v396_v24 = vpop.permute.xlu0 %395 }
 0x124   : > { %v406_v27 = vmul.f32 %v398_v23, %v1256_v21  ;;  %v405_v28 = vmul.f32 %v396_v24, %v1259_v22  ;;  %v534_v23 = vadd.f32 %v533_v54, %v529_v5  ;;  %v572_v24 = vmul.f32 %v1376_v63, %v1236_v13 }
 0x126   : > { %v412_v35 = vadd.f32 %v411_v26, %v406_v27  ;;  %v409_v36 = vadd.f32 %v408_v15, %v405_v28  ;;  %v569_v15 = vmul.f32 %v1366_v49, %v1218_v6  ;;  %v571_v6 = vmul.f32 %v1378_v0, %v1239_v14 }
 0x127   : > { %v440_v41 = vpop.permute.xlu1 %439  ;;  %v438_v43 = vpop.permute.xlu0 %437  ;;  %v578_v27 = vadd.f32 %v570_v58, %v568_v57 }
 0x128   : > { %v414_v51 = vmul.f32 0.25, %v412_v35  ;;  %v413_v53 = vmul.f32 0.25, %v409_v36  ;;  %v448_v44 = vmul.f32 %v440_v41, %v1256_v21  ;;  %v447_v42 = vmul.f32 %v438_v43, %v1259_v22 }
 0x129   : > { %v575_v26 = vadd.f32 %v569_v15, %v567_v60  ;;  %v579_v28 = vadd.f32 %v578_v27, %v572_v24 }
 0x12a   : > { %v418_v56 = vsel %vm416_vm2, %v414_v51, 0.0  ;;  %v417_v61 = vsel %vm416_vm2, %v413_v53, 0.0  ;;  %v454_v62 = vadd.f32 %v453_v37, %v448_v44  ;;  %v451_v1 = vadd.f32 %v450_v38, %v447_v42 }
 0x12b   : > { %746 = vst [vmem:[%s1274_s18 + $0x38] sm:$0xff] %v418_v56  ;;  %745 = vst [vmem:[%s1274_s18 + $0x30] sm:$0xff] %v417_v61  ;;  %v482_v45 = vpop.permute.xlu1 %481  ;;  %v480_v7 = vpop.permute.xlu0 %479  ;;  %v576_v29 = vadd.f32 %v575_v26, %v571_v6 }
 0x12c   : > { %v456_v46 = vmul.f32 0.25, %v454_v62  ;;  %v455_v48 = vmul.f32 0.25, %v451_v1  ;;  %v490_v9 = vmul.f32 %v482_v45, %v1256_v21  ;;  %v489_v10 = vmul.f32 %v480_v7, %v1259_v22 }
 0x12e   : > { %v460_v16 = vsel %vm458_vm3, %v456_v46, 0.0  ;;  %v459_v17 = vsel %vm458_vm3, %v455_v48, 0.0  ;;  %v496_v18 = vadd.f32 %v495_v2, %v490_v9  ;;  %v493_v19 = vadd.f32 %v492_v3, %v489_v10 }
 0x12f   : > { %748 = vst [vmem:[%s1274_s18 + $0x48] sm:$0xff] %v460_v16  ;;  %747 = vst [vmem:[%s1274_s18 + $0x40] sm:$0xff] %v459_v17  ;;  %v524_v8 = vpop.permute.xlu1 %523  ;;  %v522_v12 = vpop.permute.xlu0 %521 }
 0x130   : > { %v498_v49 = vmul.f32 0.25, %v496_v18  ;;  %v497_v50 = vmul.f32 0.25, %v493_v19  ;;  %v532_v52 = vmul.f32 %v524_v8, %v1256_v21  ;;  %v531_v25 = vmul.f32 %v522_v12, %v1259_v22 }
 0x132   : > { %v502_v13 = vsel %vm500_vm4, %v498_v49, 0.0  ;;  %v501_v14 = vsel %vm500_vm4, %v497_v50, 0.0  ;;  %v538_v63 = vadd.f32 %v537_v20, %v532_v52  ;;  %v535_v0 = vadd.f32 %v534_v23, %v531_v25 }
 0x133   : > { %750 = vst [vmem:[%s1274_s18 + $0x58] sm:$0xff] %v502_v13  ;;  %749 = vst [vmem:[%s1274_s18 + $0x50] sm:$0xff] %v501_v14  ;;  %v566_v30 = vpop.permute.xlu1 %565  ;;  %v564_v31 = vpop.permute.xlu0 %563 }
 0x134   : > { %v540_v32 = vmul.f32 0.25, %v538_v63  ;;  %v539_v33 = vmul.f32 0.25, %v535_v0  ;;  %v574_v34 = vmul.f32 %v566_v30, %v1256_v21  ;;  %v573_v35 = vmul.f32 %v564_v31, %v1259_v22 }
 0x136   : > { %v544_v36 = vsel %vm542_vm5, %v540_v32, 0.0  ;;  %v543_v37 = vsel %vm542_vm5, %v539_v33, 0.0  ;;  %v580_v38 = vadd.f32 %v579_v28, %v574_v34  ;;  %v577_v39 = vadd.f32 %v576_v29, %v573_v35 }
 0x137   : > { %752 = vst [vmem:[%s1274_s18 + $0x68] sm:$0xff] %v544_v36  ;;  %751 = vst [vmem:[%s1274_s18 + $0x60] sm:$0xff] %v543_v37 }
 0x138   : > { %v582_v40 = vmul.f32 0.25, %v580_v38  ;;  %v581_v41 = vmul.f32 0.25, %v577_v39 }
 0x13a   : > { %v586_v21 = vsel %vm584_vm6, %v582_v40, 0.0  ;;  %v585_v22 = vsel %vm584_vm6, %v581_v41, 0.0 }
 0x13b   : > { %754 = vst [vmem:[%s1274_s18 + $0x78] sm:$0xff] %v586_v21  ;;  %753 = vst [vmem:[%s1274_s18 + $0x70] sm:$0xff] %v585_v22 }
 0x13c   : > { %914 = shalt.err (!%p911_p11)
}
 0x13d   : > { %s915_s21 = scalar_lea.hbm %s1451_s29, 2048  ;;  %s919_s28 = scalar_lea.hbm %s1506_s2, 4096 }
 0x13e   : > { %p916_p1 = scmp.ne.s32.totalorder %s1451_s29, %s915_s21  ;;  %p920_p5 = scmp.lt.u32.totalorder %s1451_s29, %s1506_s2 }
 0x13f   : > { %p921_p4 = scmp.lt.u32.totalorder %s919_s28, %s915_s21  ;;  %p923_p0 = scmp.lt.u32.totalorder %s915_s21, %s1451_s29 }
 0x140   : > { %p917_p6 = pnand %p916_p1, %p1517_p3 }
 0x141   : > { %p922_p8 = por %p921_p4, %p920_p5 }
 0x142   : > { %p918_p2 = pneg %p917_p6 }
 0x143   : > { %p924_p12 = por %p923_p0, %p922_p8 }
 0x145   : > { %p925_p13 = pnand %p924_p12, %p918_p2 }
 0x147   : > { %928 = shalt.err (!%p925_p13)
}
 0x148   : > { %s1001_s15 = smov 128   ;;  %s1002_s26 = smov 8  }
 0x149   : > { %767 = dma.vmem_to_hbm [thread:$0]  (%p1517_p3), %s1453_s20, 2048, %s1451_s29, %s591_s12, %s1001_s15, %s1001_s15, %s1002_s26  }
 0x14a PF: > { %s624_s16 = sand.u32 1, %s967_s9   ;;  %p1518_p7 = scmp.ne.s32.totalorder %s1512_s24, 0 }
 0x14b   : > { %p1519_p10 = scmp.ge.s32.totalorder %s987_s14, 2  ;;  %s625_s27 = scalar_lea.sflag [#allocation4], %s624_s16 }
 0x14d   : > { %p777_p9 = pnand %p1519_p10, %p1518_p7 }
 0x14f   : > { %962 = dma.done.wait (!%p777_p9), %s625_s27, 2048  }
 0x150   : > { %964 = vsyncadd (!%p777_p9), %s625_s27, 4294965248  ;;  %s21_s14 = sadd.s32 1, %s987_s14   ;;  %s1520_s9 = smov %s971_s10 }
 0x151   : > { %p18_p11 = scmp.ge.s32.totalorder %s21_s14, 4   ;;  %s1521_s10 = smov %s975_s11 }
 0x152   : > { %s1522_s11 = smov %s1074_s23  ;;  %s1523_s12 = smov %s983_s13 }
 0x153   : > { %s1524_s13 = smov %s1526_s17  ;;  %20 = sbr.rel (!%p18_p11) target bundleno = 8 (0x8), region = 93 }
 0x15a   :  { %630 = vsyncpa [#allocation3], 1 }
 0x15b   :  { %632 = vsyncpa [#allocation3 + $0x1], 1 }
 0x15c   :  { %633 = vsyncpa [#allocation6], 1 }
 0x15d   :  { %635 = vsyncpa [#allocation6 + $0x1], 1 }
 0x15e   :  { %636 = vsyncpa [#allocation4], 1 }
 0x15f   :  { %638 = vsyncpa [#allocation4 + $0x1], 1 }

</bundles_post_ra>
